<compile_context>
chip_gen: v7x
topology: tpu7x:2x2x1
jax: 0.10.0
libtpu: 0.0.40
codegen_flags: <defaults>
</compile_context>

<pallas_src>
import jax
import jax.numpy as jnp
from jax.experimental import pallas as pl
from jax.experimental.pallas import tpu as pltpu

# ---- model hyper-parameters (CustomConv1.__init__ defaults) ----
C1, K1 = 3, 3            # conv1 = nn.Conv1d(1, 3, 3)
C2, K2 = 5, 5            # conv2 = nn.Conv1d(3, 5, 5)
HIDDEN = 50              # fc1   = nn.Linear(50, 2)
NCLASS = 2

L_IN = 50                # input width such that flatten size == HIDDEN
L1 = L_IN - K1 + 1       # 48  (conv1 output width)
P1 = L1 // 2             # 24  (after max_pool1d(2,2))
L2 = P1 - K2 + 1         # 20  (conv2 output width)
P2 = L2 // 2             # 10  (after max_pool1d(2,2))
RP1 = C1 * P1            # 72  pooled conv1 rows (channel-major)  -- 8-aligned
RP2 = C2 * P2            # 50  pooled conv2 rows (== HIDDEN, torch flatten order)
RP2P = 56                # RP2 padded up to a multiple of 8 for an aligned stacked split
assert RP2 == HIDDEN

N_TILE = 2048            # max batch lanes per grid step (adaptively clamped for small n)


def custom_conv1_kernel(x_ref, w1s_ref, b1_ref, w2s_ref, b2_ref,
                        wfc_ref, bfc_ref, out_ref):
    # x_ref:   (L_IN, NT)  bf16, batch on lanes
    # w1s_ref: (2*RP1, L_IN)  bf16   stacked [even;odd] pool-folded conv1 band
    # b1_ref:  (RP1, 1)       f32
    # w2s_ref: (2*RP2P, RP1)  bf16   stacked [even;odd] pool-folded conv2 band (rows padded)
    # b2_ref:  (RP2P, 1)      f32    (zero-padded)
    # wfc_ref: (NCLASS, RP2P) bf16   fc1 weight (zero-padded columns)
    # bfc_ref: (NCLASS, 1)    f32
    # out_ref: (NCLASS, NT)   f32    softmax probabilities
    f32 = jnp.float32
    bf16 = jnp.bfloat16
    x = x_ref[...]

    # conv1 -> ReLU -> maxpool(2,2): single stacked matmul, then row-half max.
    z1s = jnp.dot(w1s_ref[...], x, preferred_element_type=f32)          # (2*RP1, NT)
    z1 = jnp.maximum(z1s[:RP1, :], z1s[RP1:, :])
    p1 = jnp.maximum(z1 + b1_ref[...], 0.0)                              # (RP1, NT) f32

    # conv2 -> ReLU -> maxpool(2,2)
    z2s = jnp.dot(w2s_ref[...], p1.astype(bf16), preferred_element_type=f32)  # (2*RP2P, NT)
    z2 = jnp.maximum(z2s[:RP2P, :], z2s[RP2P:, :])
    p2 = jnp.maximum(z2 + b2_ref[...], 0.0)                              # (RP2P, NT) f32

    # flatten(1) + fc1 + softmax over the 2 classes (explicit 2-row form, exact divide)
    logits = (jnp.dot(wfc_ref[...], p2.astype(bf16), preferred_element_type=f32)
              + bfc_ref[...])                                            # (2, NT)
    l0 = logits[0:1, :]
    l1 = logits[1:2, :]
    m = jnp.maximum(l0, l1)
    e0 = jnp.exp(l0 - m)
    e1 = jnp.exp(l1 - m)
    inv = 1.0 / (e0 + e1)
    out_ref[...] = jnp.concatenate([e0 * inv, e1 * inv], axis=0)


# ---------------- wrapper-side constant construction (runs once per compile) ------------

def _band_matrix(w, l_out, l_in):
    """(Cout*l_out, Cin*l_in) matrix M with M[co*l_out+i, ci*l_in+i+k] = w[co, ci, k]."""
    c_out, c_in, k = w.shape
    diff = jnp.arange(l_in)[None, :] - jnp.arange(l_out)[:, None]        # j - i
    valid = ((diff >= 0) & (diff < k)).astype(w.dtype)                   # (l_out, l_in)
    band = w[:, :, jnp.clip(diff, 0, k - 1)] * valid[None, None]         # (Cout, Cin, l_out, l_in)
    return band.transpose(0, 2, 1, 3).reshape(c_out * l_out, c_in * l_in)


def _pool_select(channels, l_in, parity):
    """(channels*(l_in//2), channels*l_in) 0/1 matrix picking column c*l_in + 2j + parity."""
    l_out = l_in // 2
    rows = jnp.arange(channels * l_out)
    col = (rows // l_out) * l_in + 2 * (rows % l_out) + parity
    return (jnp.arange(channels * l_in)[None, :] == col[:, None]).astype(jnp.float32)


def _round_up(a, b):
    return -(-a // b) * b


@jax.jit
def custom_conv1_forward(x, w1, b1, w2, b2, wfc, bfc):
    """x: (N, 1, L_IN) float32 (NCW, as in PyTorch). Returns (N, NCLASS) softmax probs."""
    f32, bf16 = jnp.float32, jnp.bfloat16
    n = x.shape[0]
    n_tile = min(N_TILE, _round_up(n, 128))       # adaptive tile: small batch -> small tile
    n_pad = _round_up(n, n_tile)

    # Batch on lanes: (L_IN, N), bf16 (halves transpose + kernel DMA traffic), zero-padded.
    xT = x.astype(bf16).reshape(n, L_IN).T
    xT = jnp.pad(xT, ((0, 0), (0, n_pad - n)))

    # Fold banded conv matrices with the even/odd max-pool selections, then stack even/odd
    # into one matmul constant per layer (built once here, resident in VMEM across the grid).
    w1band = _band_matrix(w1.astype(f32).reshape(C1, 1, K1), L1, L_IN)   # (C1*L1, L_IN)
    w2band = _band_matrix(w2.astype(f32), L2, P1)                        # (C2*L2, C1*P1)
    w1e = _pool_select(C1, L1, 0) @ w1band                               # (RP1, L_IN)
    w1o = _pool_select(C1, L1, 1) @ w1band
    w2e = _pool_select(C2, L2, 0) @ w2band                               # (RP2, RP1)
    w2o = _pool_select(C2, L2, 1) @ w2band
    w1s = jnp.concatenate([w1e, w1o], axis=0).astype(bf16)               # (2*RP1, L_IN)
    w2s = jnp.concatenate([jnp.pad(w2e, ((0, RP2P - RP2), (0, 0))),
                           jnp.pad(w2o, ((0, RP2P - RP2), (0, 0)))],
                          axis=0).astype(bf16)                           # (2*RP2P, RP1)
    b1p = jnp.repeat(b1.astype(f32), P1).reshape(RP1, 1)
    b2p = jnp.pad(jnp.repeat(b2.astype(f32), P2), (0, RP2P - RP2)).reshape(RP2P, 1)
    wfck = jnp.pad(wfc.astype(f32).reshape(NCLASS, RP2),
                   ((0, 0), (0, RP2P - RP2))).astype(bf16)               # (NCLASS, RP2P)
    bfck = bfc.astype(f32).reshape(NCLASS, 1)

    const = lambda shape: pl.BlockSpec(shape, lambda i: (0, 0))          # resident across grid

    out = pl.pallas_call(
        custom_conv1_kernel,
        out_shape=jax.ShapeDtypeStruct((NCLASS, n_pad), f32),
        grid=(n_pad // n_tile,),
        in_specs=[
            pl.BlockSpec((L_IN, n_tile), lambda i: (0, i)),              # x tile (double-buffered)
            const((2 * RP1, L_IN)), const((RP1, 1)),
            const((2 * RP2P, RP1)), const((RP2P, 1)),
            const((NCLASS, RP2P)), const((NCLASS, 1)),
        ],
        out_specs=pl.BlockSpec((NCLASS, n_tile), lambda i: (0, i)),
        compiler_params=pltpu.CompilerParams(
            dimension_semantics=("parallel",)),                          # 2 TCs on v7x
    )(xT, w1s, b1p, w2s, b2p, wfck, bfck)

    return out[:, :n].T                                                  # (N, NCLASS)


# ---------------- pure-JAX reference (for correctness check only) -----------------------

def _ref_conv1d(x, w, b):
    k = w.shape[2]
    l_out = x.shape[2] - k + 1
    cols = jnp.stack([x[:, :, i:i + l_out] for i in range(k)], axis=-1)  # (N, Cin, Lout, K)
    return jnp.einsum('nilk,oik->nol', cols, w) + b[None, :, None]


def reference_forward(x, w1, b1, w2, b2, wfc, bfc):
    y = jnp.maximum(_ref_conv1d(x, w1, b1), 0.0)
    y = jnp.maximum(y[:, :, 0::2], y[:, :, 1::2])
    y = jnp.maximum(_ref_conv1d(y, w2, b2), 0.0)
    y = jnp.maximum(y[:, :, 0::2], y[:, :, 1::2])
    logits = y.reshape(y.shape[0], -1) @ wfc.T + bfc[None, :]
    return jax.nn.softmax(logits, axis=1)


if __name__ == "__main__":
    key = jax.random.PRNGKey(0)
    kx, k1, k2, k3, k4, k5, k6 = jax.random.split(key, 7)
    N = 2

    def u(k, shape, fan_in):
        bound = 1.0 / (fan_in ** 0.5)
        return jax.random.uniform(k, shape, jnp.float32, -bound, bound)

    # deterministic synthetic parameters, torch parameter shapes
    x = jax.random.normal(kx, (N, 1, L_IN), jnp.float32)
    w1 = u(k1, (C1, 1, K1), 1 * K1)
    b1 = u(k2, (C1,), 1 * K1)
    w2 = u(k3, (C2, C1, K2), C1 * K2)
    b2 = u(k4, (C2,), C1 * K2)
    wfc = u(k5, (NCLASS, HIDDEN), HIDDEN)
    bfc = u(k6, (NCLASS,), HIDDEN)

    out = custom_conv1_forward(x, w1, b1, w2, b2, wfc, bfc)
    out = jax.block_until_ready(out)
    ref = reference_forward(x, w1, b1, w2, b2, wfc, bfc)

    assert out.shape == (N, NCLASS)
    assert bool(jnp.all(jnp.isfinite(out)))
    # tolerance covers bf16 MXU inputs (accumulation stays f32; softmax divide is exact)
    assert jnp.allclose(out, ref, atol=1e-2, rtol=1e-2), (out, ref)
    print("KERNEL_OK")
</pallas_src>

<mosaic_0001>
module attributes {stable_mosaic.version = 11 : i64} {
  func.func @custom_conv1_kernel(%arg0: i32, %arg1: memref<50x128xbf16, #tpu.memory_space<vmem>>, %arg2: memref<144x50xbf16, #tpu.memory_space<vmem>>, %arg3: memref<72x1xf32, #tpu.memory_space<vmem>>, %arg4: memref<112x72xbf16, #tpu.memory_space<vmem>>, %arg5: memref<56x1xf32, #tpu.memory_space<vmem>>, %arg6: memref<2x56xbf16, #tpu.memory_space<vmem>>, %arg7: memref<2x1xf32, #tpu.memory_space<vmem>>, %arg8: memref<2x128xf32, #tpu.memory_space<vmem>>) attributes {dimension_semantics = [#tpu.dimension_semantics<parallel>], iteration_bounds = array<i64: 1>, scalar_prefetch = 0 : i64, scratch_operands = 0 : i64, tpu.core_type = #tpu.core_type<tc>, window_params = [{transform_indices = @transform_0, window_bounds = array<i64: 50, 128>}, {pipeline_mode = #tpu.pipeline_mode<synchronous>, transform_indices = @transform_1, window_bounds = array<i64: 144, 50>}, {pipeline_mode = #tpu.pipeline_mode<synchronous>, transform_indices = @transform_2, window_bounds = array<i64: 72, 1>}, {pipeline_mode = #tpu.pipeline_mode<synchronous>, transform_indices = @transform_3, window_bounds = array<i64: 112, 72>}, {pipeline_mode = #tpu.pipeline_mode<synchronous>, transform_indices = @transform_4, window_bounds = array<i64: 56, 1>}, {pipeline_mode = #tpu.pipeline_mode<synchronous>, transform_indices = @transform_5, window_bounds = array<i64: 2, 56>}, {pipeline_mode = #tpu.pipeline_mode<synchronous>, transform_indices = @transform_6, window_bounds = array<i64: 2, 1>}, {transform_indices = @transform_7, window_bounds = array<i64: 2, 128>}]} {
    %c0 = arith.constant 0 : index
    %c0_0 = arith.constant 0 : index
    %0 = vector.load %arg1[%c0, %c0_0] : memref<50x128xbf16, #tpu.memory_space<vmem>>, vector<50x128xbf16>
    %c0_1 = arith.constant 0 : index
    %c0_2 = arith.constant 0 : index
    %1 = vector.load %arg2[%c0_1, %c0_2] : memref<144x50xbf16, #tpu.memory_space<vmem>>, vector<144x50xbf16>
    %cst = arith.constant dense<0.000000e+00> : vector<144x128xf32>
    %2 = tpu.matmul %1, %0, %cst {dimension_numbers = #tpu.dot_dimension_numbers<[1], [0], [0], [1], [0, 0, 1, 1], [], []>} : vector<144x50xbf16>, vector<50x128xbf16>, vector<144x128xf32> -> vector<144x128xf32>
    %3 = vector.extract_strided_slice %2 {offsets = [0, 0], sizes = [72, 128], strides = [1, 1]} : vector<144x128xf32> to vector<72x128xf32>
    %4 = vector.extract_strided_slice %2 {offsets = [72, 0], sizes = [72, 128], strides = [1, 1]} : vector<144x128xf32> to vector<72x128xf32>
    %5 = arith.maximumf %3, %4 : vector<72x128xf32>
    %c0_3 = arith.constant 0 : index
    %c0_4 = arith.constant 0 : index
    %6 = vector.load %arg3[%c0_3, %c0_4] : memref<72x1xf32, #tpu.memory_space<vmem>>, vector<72x1xf32>
    %7 = vector.broadcast %6 : vector<72x1xf32> to vector<72x128xf32>
    %8 = arith.addf %5, %7 : vector<72x128xf32>
    %cst_5 = arith.constant 0.000000e+00 : f32
    %9 = vector.broadcast %cst_5 : f32 to vector<72x128xf32>
    %10 = arith.maximumf %8, %9 : vector<72x128xf32>
    %c0_6 = arith.constant 0 : index
    %c0_7 = arith.constant 0 : index
    %11 = vector.load %arg4[%c0_6, %c0_7] : memref<112x72xbf16, #tpu.memory_space<vmem>>, vector<112x72xbf16>
    %12 = arith.truncf %10 : vector<72x128xf32> to vector<72x128xbf16>
    %cst_8 = arith.constant dense<0.000000e+00> : vector<112x128xf32>
    %13 = tpu.matmul %11, %12, %cst_8 {dimension_numbers = #tpu.dot_dimension_numbers<[1], [0], [0], [1], [0, 0, 1, 1], [], []>} : vector<112x72xbf16>, vector<72x128xbf16>, vector<112x128xf32> -> vector<112x128xf32>
    %14 = vector.extract_strided_slice %13 {offsets = [0, 0], sizes = [56, 128], strides = [1, 1]} : vector<112x128xf32> to vector<56x128xf32>
    %15 = vector.extract_strided_slice %13 {offsets = [56, 0], sizes = [56, 128], strides = [1, 1]} : vector<112x128xf32> to vector<56x128xf32>
    %16 = arith.maximumf %14, %15 : vector<56x128xf32>
    %c0_9 = arith.constant 0 : index
    %c0_10 = arith.constant 0 : index
    %17 = vector.load %arg5[%c0_9, %c0_10] : memref<56x1xf32, #tpu.memory_space<vmem>>, vector<56x1xf32>
    %18 = vector.broadcast %17 : vector<56x1xf32> to vector<56x128xf32>
    %19 = arith.addf %16, %18 : vector<56x128xf32>
    %cst_11 = arith.constant 0.000000e+00 : f32
    %20 = vector.broadcast %cst_11 : f32 to vector<56x128xf32>
    %21 = arith.maximumf %19, %20 : vector<56x128xf32>
    %c0_12 = arith.constant 0 : index
    %c0_13 = arith.constant 0 : index
    %22 = vector.load %arg6[%c0_12, %c0_13] : memref<2x56xbf16, #tpu.memory_space<vmem>>, vector<2x56xbf16>
    %23 = arith.truncf %21 : vector<56x128xf32> to vector<56x128xbf16>
    %cst_14 = arith.constant dense<0.000000e+00> : vector<2x128xf32>
    %24 = tpu.matmul %22, %23, %cst_14 {dimension_numbers = #tpu.dot_dimension_numbers<[1], [0], [0], [1], [0, 0, 1, 1], [], []>} : vector<2x56xbf16>, vector<56x128xbf16>, vector<2x128xf32> -> vector<2x128xf32>
    %c0_15 = arith.constant 0 : index
    %c0_16 = arith.constant 0 : index
    %25 = vector.load %arg7[%c0_15, %c0_16] : memref<2x1xf32, #tpu.memory_space<vmem>>, vector<2x1xf32>
    %26 = vector.broadcast %25 : vector<2x1xf32> to vector<2x128xf32>
    %27 = arith.addf %24, %26 : vector<2x128xf32>
    %28 = vector.extract_strided_slice %27 {offsets = [0, 0], sizes = [1, 128], strides = [1, 1]} : vector<2x128xf32> to vector<1x128xf32>
    %29 = vector.extract_strided_slice %27 {offsets = [1, 0], sizes = [1, 128], strides = [1, 1]} : vector<2x128xf32> to vector<1x128xf32>
    %30 = arith.maximumf %28, %29 : vector<1x128xf32>
    %31 = arith.subf %28, %30 : vector<1x128xf32>
    %32 = math.exp %31 : vector<1x128xf32>
    %33 = arith.subf %29, %30 : vector<1x128xf32>
    %34 = math.exp %33 : vector<1x128xf32>
    %35 = arith.addf %32, %34 : vector<1x128xf32>
    %cst_17 = arith.constant 1.000000e+00 : f32
    %36 = vector.broadcast %cst_17 : f32 to vector<1x128xf32>
    %37 = arith.divf %36, %35 : vector<1x128xf32>
    %38 = arith.mulf %32, %37 : vector<1x128xf32>
    %39 = arith.mulf %34, %37 : vector<1x128xf32>
    %40 = tpu.concatenate %38, %39 in 0 : vector<1x128xf32>, vector<1x128xf32> -> vector<2x128xf32>
    %c0_18 = arith.constant 0 : index
    %c0_19 = arith.constant 0 : index
    %41 = vector.load %arg8[%c0_18, %c0_19] : memref<2x128xf32, #tpu.memory_space<vmem>>, vector<2x128xf32>
    tpu.vector_store %arg8[%c0_18, %c0_19], %40 {strides = array<i32>} : memref<2x128xf32, #tpu.memory_space<vmem>>, vector<2x128xf32>,
    return
  }
  func.func @transform_0(%arg0: i32) -> (i32, i32) {
    %c0_i32 = arith.constant 0 : i32
    %c0_i32_0 = arith.constant 0 : i32
    return %c0_i32, %arg0 : i32, i32
  }
  func.func @transform_1(%arg0: i32) -> (i32, i32) {
    %c0_i32 = arith.constant 0 : i32
    %c0_i32_0 = arith.constant 0 : i32
    %c0_i32_1 = arith.constant 0 : i32
    return %c0_i32, %c0_i32_0 : i32, i32
  }
  func.func @transform_2(%arg0: i32) -> (i32, i32) {
    %c0_i32 = arith.constant 0 : i32
    %c0_i32_0 = arith.constant 0 : i32
    %c0_i32_1 = arith.constant 0 : i32
    return %c0_i32, %c0_i32_0 : i32, i32
  }
  func.func @transform_3(%arg0: i32) -> (i32, i32) {
    %c0_i32 = arith.constant 0 : i32
    %c0_i32_0 = arith.constant 0 : i32
    %c0_i32_1 = arith.constant 0 : i32
    return %c0_i32, %c0_i32_0 : i32, i32
  }
  func.func @transform_4(%arg0: i32) -> (i32, i32) {
    %c0_i32 = arith.constant 0 : i32
    %c0_i32_0 = arith.constant 0 : i32
    %c0_i32_1 = arith.constant 0 : i32
    return %c0_i32, %c0_i32_0 : i32, i32
  }
  func.func @transform_5(%arg0: i32) -> (i32, i32) {
    %c0_i32 = arith.constant 0 : i32
    %c0_i32_0 = arith.constant 0 : i32
    %c0_i32_1 = arith.constant 0 : i32
    return %c0_i32, %c0_i32_0 : i32, i32
  }
  func.func @transform_6(%arg0: i32) -> (i32, i32) {
    %c0_i32 = arith.constant 0 : i32
    %c0_i32_0 = arith.constant 0 : i32
    %c0_i32_1 = arith.constant 0 : i32
    return %c0_i32, %c0_i32_0 : i32, i32
  }
  func.func @transform_7(%arg0: i32) -> (i32, i32) {
    %c0_i32 = arith.constant 0 : i32
    %c0_i32_0 = arith.constant 0 : i32
    return %c0_i32, %arg0 : i32, i32
  }
}

</mosaic_0001>

<bundles_post_ra>
// kernel: custom_conv1_forward.1
= control target key start
LH: loop header
LB: loop body
LE: loop exit
PB: predicated region body
PF: predicated region fallthrough
CT: control target
= control target key end

     0   :  { %v848_v0 = vmov 0.0   ;;  %vm849_vm0 = vmmov 0   ;;  %v850_v2 = vmov 0   ;;  %vm146_vm1 = vcmask 1040384   ;;  %s1078_s0 = inlined_call_operand.vmem [shape: bf16[50,128], index: 0, kind: input, shape index: {}]   ;;  %s1079_s1 = inlined_call_operand.vmem [shape: bf16[144,50], index: 1, kind: input, shape index: {}]   ;;  %s1080_s2 = inlined_call_operand.vmem [shape: f32[72,1], index: 2, kind: input, shape index: {}]   ;;  %s1081_s4 = inlined_call_operand.vmem [shape: f32[56,1], index: 4, kind: input, shape index: {}]   ;;  %s1082_s6 = inlined_call_operand.vmem [shape: f32[2,1], index: 6, kind: input, shape index: {}]   ;;  %s1083_s3 = inlined_call_operand.vmem [shape: bf16[112,72], index: 3, kind: input, shape index: {}]   ;;  %s1084_s5 = inlined_call_operand.vmem [shape: bf16[2,56], index: 5, kind: input, shape index: {}]   ;;  %s1085_s7 = inlined_call_operand.vmem [shape: f32[2,128], index: 7, kind: output, shape index: {}]  }
   0x1   :  { %723 = vmatprep.subr.bf16.mxu0 %v848_v0  ;;  %v822_v1 = vld [vmem:[%s1078_s0] sm:$0xff]   ;;  %731 = vmatprep.mubr.msk.bf16.mxu0 %vm849_vm0, %v848_v0  ;;  %v823_v3 = vld [vmem:[%s1078_s0 + $0x8] sm:$0xff]   ;;  %v825_v4 = vld [vmem:[%s1078_s0 + $0x18] ss:$0 sps:$4 sm:$0x11]   ;;  %vm118_vm2 = vcmask 408576  }
   0x2   :  { %820 = vset.pattern.permute.xlu0 %v850_v2  ;;  %821 = vset.pattern.permute.xlu1 %v850_v2  ;;  %v824_v5 = vld [vmem:[%s1078_s0 + $0x10] sm:$0xff]   ;;  %v148_v6 = vsel %vm146_vm1, %v825_v4, 0  ;;  %v264_v7 = vld [vmem:[%s1080_s2] sm:$0xff]  ;;  %v265_v10 = vld [vmem:[%s1080_s2 + $0x8] sm:$0xff]  ;;  %vm412_vm3 = vcmask 1043456   ;;  %vm390_vm4 = vcmask 588800  }
   0x3   :  { %724 = vmatpush3.bf16.msra.mxu0 %v822_v1  ;;  %767 = vmatprep.subr.bf16.mxu1 %v848_v0  ;;  %v826_v8 = vld [vmem:[%s1079_s1] sm:$0xff]   ;;  %v266_v9 = vld [vmem:[%s1080_s2 + $0x10] sm:$0xff]  ;;  %v267_v11 = vld [vmem:[%s1080_s2 + $0x18] sm:$0xff]  ;;  %vm579_vm5 = vcmask 457728  }
   0x4   :  { %725 = vmatprep.subr.bf16.mxu0 %v848_v0  ;;  %777 = vmatprep.mubr.msk.bf16.mxu1 %vm849_vm0, %v848_v0  ;;  %v268_v12 = vld [vmem:[%s1080_s2 + $0x20] sm:$0xff]  ;;  %v269_v13 = vld [vmem:[%s1080_s2 + $0x28] sm:$0xff]  ;;  %v270_v15 = vld [vmem:[%s1080_s2 + $0x30] sm:$0xff] }
   0x5   :  { %275 = vperm.xlu0 %820, %v264_v7   ;;  %285 = vperm.xlu1 %821, %v266_v9   ;;  %v827_v14 = vld [vmem:[%s1079_s1 + $0x8] sm:$0xff]   ;;  %v271_v16 = vld [vmem:[%s1080_s2 + $0x38] sm:$0xff]  ;;  %v272_v17 = vld [vmem:[%s1080_s2 + $0x40] sm:$0xff] }
   0x6   :  { %v512_v18 = vld [vmem:[%s1081_s4] sm:$0xff]  ;;  %v828_v19 = vld [vmem:[%s1079_s1 + $0x10] sm:$0xff]   ;;  %v513_v20 = vld [vmem:[%s1081_s4 + $0x8] sm:$0xff] }
   0x7   :  { %726 = vmatpush3.bf16.msra.mxu0 %v823_v3  ;;  %v514_v21 = vld [vmem:[%s1081_s4 + $0x10] sm:$0xff]  ;;  %v515_v22 = vld [vmem:[%s1081_s4 + $0x18] sm:$0xff]  ;;  %v516_v23 = vld [vmem:[%s1081_s4 + $0x20] sm:$0xff] }
   0x8   :  { %727 = vmatprep.subr.bf16.mxu0 %v848_v0  ;;  %v829_v24 = vld [vmem:[%s1079_s1 + $0x18] sm:$0xff]   ;;  %v517_v25 = vld [vmem:[%s1081_s4 + $0x28] sm:$0xff]  ;;  %v518_v26 = vld [vmem:[%s1081_s4 + $0x30] sm:$0xff] }
   0x9   :  { %280 = vperm.xlu0 %820, %v265_v10   ;;  %290 = vperm.xlu1 %821, %v267_v11   ;;  %v573_v27 = vld [vmem:[%s1082_s6] sm:$0x3]  ;;  %v831_v29 = vld [vmem:[%s1079_s1 + $0x28] sm:$0xff]   ;;  %v832_v30 = vld [vmem:[%s1079_s1 + $0x30] sm:$0xff]  }
   0xa   :  { %v830_v28 = vld [vmem:[%s1079_s1 + $0x20] sm:$0xff]   ;;  %v833_v31 = vld [vmem:[%s1079_s1 + $0x38] sm:$0xff]  }
   0xb   :  { %728 = vmatpush3.bf16.msra.mxu0 %v824_v5  ;;  %v834_v32 = vld [vmem:[%s1079_s1 + $0x40] sm:$0xff]  }
   0xc   :  { %729 = vmatprep.subr.bf16.mxu0 %v848_v0 }
   0xd   :  { %295 = vperm.xlu0 %820, %v268_v12   ;;  %300 = vperm.xlu1 %821, %v269_v13  }
   0xf   :  { %730 = vmatpush3.bf16.msra.mxu0 %v148_v6 }
  0x11   :  { %305 = vperm.xlu0 %820, %v270_v15   ;;  %310 = vperm.xlu1 %821, %v271_v16  }
  0x12   :  { %732 = vmatmul.mubr.msk.bf16.vlgmr.msra.gmra.mrb[0].mxu0 %vm118_vm2, %v826_v8 }
  0x13   :  { %735 = vmatprep.mubr.msk.bf16.mxu0 %vm849_vm0, %v848_v0 }
  0x15   :  { %315 = vperm.xlu0 %820, %v272_v17   ;;  %521 = vperm.xlu1 %821, %v512_v18  }
  0x19   :  { %526 = vperm.xlu0 %820, %v513_v20   ;;  %531 = vperm.xlu1 %821, %v514_v21  }
  0x1a   :  { %736 = vmatmul.mubr.msk.bf16.gmra.mrb[4].mxu0 %vm118_vm2, %v827_v14 }
  0x1b   :  { %739 = vmatprep.mubr.msk.bf16.mxu0 %vm849_vm0, %v848_v0 }
  0x1d   :  { %536 = vperm.xlu0 %820, %v515_v22   ;;  %541 = vperm.xlu1 %821, %v516_v23  }
  0x21   :  { %546 = vperm.xlu0 %820, %v517_v25   ;;  %551 = vperm.xlu1 %821, %v518_v26  }
  0x22   :  { %740 = vmatmul.mubr.msk.bf16.gmra.mrb[8].mxu0 %vm118_vm2, %v828_v19 }
  0x23   :  { %743 = vmatprep.mubr.msk.bf16.mxu0 %vm849_vm0, %v848_v0 }
  0x25   :  { %576 = vperm.xlu0 %820, %v573_v27  }
  0x2a   :  { %744 = vmatmul.mubr.msk.bf16.gmra.mrb[12].mxu0 %vm118_vm2, %v829_v24 }
  0x2b   :  { %747 = vmatprep.mubr.msk.bf16.mxu0 %vm849_vm0, %v848_v0 }
  0x32   :  { %748 = vmatmul.mubr.msk.bf16.gmra.mrb[16].mxu0 %vm118_vm2, %v830_v28 }
  0x33   :  { %751 = vmatprep.mubr.msk.bf16.mxu0 %vm849_vm0, %v848_v0 }
  0x3a   :  { %752 = vmatmul.mubr.msk.bf16.gmra.mrb[20].mxu0 %vm118_vm2, %v831_v29 }
  0x3b   :  { %755 = vmatprep.mubr.msk.bf16.mxu0 %vm849_vm0, %v848_v0 }
  0x42   :  { %756 = vmatmul.mubr.msk.bf16.gmra.mrb[24].mxu0 %vm118_vm2, %v832_v30 }
  0x43   :  { %759 = vmatprep.mubr.msk.bf16.mxu0 %vm849_vm0, %v848_v0 }
  0x4a   :  { %760 = vmatmul.mubr.msk.bf16.gmra.mrb[28].mxu0 %vm118_vm2, %v833_v31 }
  0x4b   :  { %763 = vmatprep.mubr.msk.bf16.mxu0 %vm849_vm0, %v848_v0 }
  0x52   :  { %764 = vmatmul.mubr.msk.bf16.gmra.mrb[32].mxu0 %vm118_vm2, %v834_v32 }
  0x84   :  { %v276_v54 = vpop.permute.xlu0 %275  ;;  %v286_v1 = vpop.permute.xlu1 %285 }
  0x88   :  { %v281_v59 = vpop.permute.xlu0 %280  ;;  %v291_v9 = vpop.permute.xlu1 %290 }
  0x8c   :  { %v296_v17 = vpop.permute.xlu0 %295  ;;  %v301_v22 = vpop.permute.xlu1 %300 }
  0x90   :  { %v306_v29 = vpop.permute.xlu0 %305 }
  0xe5   :  { %v184_v33 = vpop.f32.mrb[0].mxu0 }
  0xe6   :  { %v733_v34 = vpop.f32.mrb[1].mxu0 }
  0xe7   :  { %v187_v35 = vpop.f32.mrb[2].mxu0 }
  0xe8   :  { %v734_v36 = vpop.f32.mrb[3].mxu0 }
  0xed   :  { %v192_v37 = vpop.f32.mrb[4].mxu0 }
  0xee   :  { %v737_v38 = vpop.f32.mrb[5].mxu0 }
  0xef   :  { %v195_v39 = vpop.f32.mrb[6].mxu0 }
  0xf0   :  { %v738_v40 = vpop.f32.mrb[7].mxu0 }
  0xf1   :  { %v316_v40 = vpop.permute.xlu0 %315 }
  0xf5   :  { %v200_v41 = vpop.f32.mrb[8].mxu0 }
  0xf6   :  { %v741_v42 = vpop.f32.mrb[9].mxu0 }
  0xf7   :  { %v203_v43 = vpop.f32.mrb[10].mxu0 }
  0xf8   :  { %v742_v44 = vpop.f32.mrb[11].mxu0 }
  0xfd   :  { %v208_v45 = vpop.f32.mrb[12].mxu0 }
  0xfe   :  { %v745_v46 = vpop.f32.mrb[13].mxu0 }
  0xff   :  { %v211_v47 = vpop.f32.mrb[14].mxu0 }
 0x100   :  { %v746_v48 = vpop.f32.mrb[15].mxu0 }
 0x101   :  { %v835_v48 = vld [vmem:[%s1083_s3] sm:$0xff]  }
 0x105   :  { %v1016_v49 = vpop.f32.mrb[16].mxu0 }
 0x106   :  { %v749_v50 = vpop.f32.mrb[17].mxu0 }
 0x107   :  { %v219_v51 = vpop.f32.mrb[18].mxu0  ;;  %v837_v50 = vld [vmem:[%s1083_s3 + $0x10] sm:$0xff]  }
 0x108   :  { %v255_v52 = vmax.f32 %v184_v33, %v219_v51  ;;  %v750_v53 = vpop.f32.mrb[19].mxu0  ;;  %v838_v51 = vld [vmem:[%s1083_s3 + $0x18] sm:$0xff]  }
 0x109   :  { %v840_v53 = vld [vmem:[%s1083_s3 + $0x28] sm:$0xff]  }
 0x10a   :  { %v318_v56 = vadd.f32 %v276_v54, %v255_v52  ;;  %v839_v52 = vld [vmem:[%s1083_s3 + $0x20] sm:$0xff]   ;;  %v841_v54 = vld [vmem:[%s1083_s3 + $0x30] sm:$0xff]  }
 0x10c   :  { %v327_v2 = vmax.f32 %v318_v56, 0.0 }
 0x10d   :  { %v224_v55 = vpop.f32.mrb[20].mxu0 }
 0x10e   :  { %v256_v57 = vmax.f32 %v187_v35, %v224_v55  ;;  %v753_v58 = vpop.f32.mrb[21].mxu0  ;;  %v311_v35 = vpop.permute.xlu1 %310 }
 0x10f   :  { %v227_v60 = vpop.f32.mrb[22].mxu0 }
 0x110   :  { %v319_v61 = vadd.f32 %v281_v59, %v256_v57  ;;  %v257_v62 = vmax.f32 %v192_v37, %v227_v60  ;;  %v754_v63 = vpop.f32.mrb[23].mxu0 }
 0x112   :  { %v328_v3 = vmax.f32 %v319_v61, 0.0  ;;  %v320_v6 = vadd.f32 %v286_v1, %v257_v62 }
 0x114   :  { %v350_v4 = vpack.c.bf16 %v328_v3, %v327_v2  ;;  %v329_v14 = vmax.f32 %v320_v6, 0.0 }
 0x115   :  { %v232_v5 = vpop.f32.mrb[24].mxu0 }
 0x116   :  { %v258_v7 = vmax.f32 %v195_v39, %v232_v5  ;;  %v757_v8 = vpop.f32.mrb[25].mxu0  ;;  %768 = vmatpush3.bf16.msra.mxu1 %v350_v4 }
 0x117   :  { %v235_v10 = vpop.f32.mrb[26].mxu0  ;;  %769 = vmatprep.subr.bf16.mxu1 %v848_v0 }
 0x118   :  { %v321_v11 = vadd.f32 %v291_v9, %v258_v7  ;;  %v259_v12 = vmax.f32 %v200_v41, %v235_v10  ;;  %v758_v13 = vpop.f32.mrb[27].mxu0  ;;  %v522_v9 = vpop.permute.xlu1 %521 }
 0x11a   :  { %v330_v15 = vmax.f32 %v321_v11, 0.0  ;;  %v322_v19 = vadd.f32 %v296_v17, %v259_v12 }
 0x11c   :  { %v351_v16 = vpack.c.bf16 %v330_v15, %v329_v14  ;;  %v331_v27 = vmax.f32 %v322_v19, 0.0  ;;  %v527_v14 = vpop.permute.xlu0 %526 }
 0x11d   :  { %v240_v18 = vpop.f32.mrb[28].mxu0 }
 0x11e   :  { %v260_v20 = vmax.f32 %v203_v43, %v240_v18  ;;  %v761_v21 = vpop.f32.mrb[29].mxu0  ;;  %770 = vmatpush3.bf16.msra.mxu1 %v351_v16 }
 0x11f   :  { %v243_v23 = vpop.f32.mrb[30].mxu0  ;;  %771 = vmatprep.subr.bf16.mxu1 %v848_v0 }
 0x120   :  { %v323_v24 = vadd.f32 %v301_v22, %v260_v20  ;;  %v261_v25 = vmax.f32 %v208_v45, %v243_v23  ;;  %v762_v26 = vpop.f32.mrb[31].mxu0  ;;  %v532_v22 = vpop.permute.xlu1 %531 }
 0x122   :  { %v332_v28 = vmax.f32 %v323_v24, 0.0  ;;  %v324_v32 = vadd.f32 %v306_v29, %v261_v25 }
 0x124   :  { %v352_v30 = vpack.c.bf16 %v332_v28, %v331_v27  ;;  %v333_v41 = vmax.f32 %v324_v32, 0.0  ;;  %v537_v27 = vpop.permute.xlu0 %536 }
 0x125   :  { %v248_v31 = vpop.f32.mrb[32].mxu0 }
 0x126   :  { %v262_v33 = vmax.f32 %v211_v47, %v248_v31  ;;  %v765_v34 = vpop.f32.mrb[33].mxu0  ;;  %772 = vmatpush3.bf16.msra.mxu1 %v352_v30 }
 0x127   :  { %v251_v36 = vpop.f32.mrb[34].mxu0  ;;  %773 = vmatprep.subr.bf16.mxu1 %v848_v0  ;;  %v542_v34 = vpop.permute.xlu1 %541 }
 0x128   :  { %v325_v37 = vadd.f32 %v311_v35, %v262_v33  ;;  %v263_v38 = vmax.f32 %v1016_v49, %v251_v36  ;;  %v766_v39 = vpop.f32.mrb[35].mxu0  ;;  %v836_v49 = vld [vmem:[%s1083_s3 + $0x8] sm:$0xff]  }
 0x12a   :  { %v334_v42 = vmax.f32 %v325_v37, 0.0  ;;  %v326_v43 = vadd.f32 %v316_v40, %v263_v38  ;;  %v547_v40 = vpop.permute.xlu0 %546 }
 0x12c   :  { %v335_v44 = vmax.f32 %v326_v43, 0.0  ;;  %v353_v45 = vpack.c.bf16 %v334_v42, %v333_v41 }
 0x12e   :  { %v354_v46 = vpack.c.bf16 %v335_v44, %v335_v44  ;;  %774 = vmatpush3.bf16.msra.mxu1 %v353_v45  ;;  %v552_v45 = vpop.permute.xlu1 %551 }
 0x12f   :  { %775 = vmatprep.subr.bf16.mxu1 %v848_v0 }
 0x130   :  { %v414_v47 = vsel %vm412_vm3, %v354_v46, 0 }
 0x132   :  { %776 = vmatpush3.bf16.msra.mxu1 %v414_v47 }
 0x133   :  { %805 = vmatprep.subr.bf16.mxu1 %v848_v0 }
 0x135   :  { %778 = vmatmul.mubr.msk.bf16.vlgmr.msra.gmra.mrb[0].mxu1 %vm390_vm4, %v835_v48 }
 0x136   :  { %781 = vmatprep.mubr.msk.bf16.mxu1 %vm849_vm0, %v848_v0 }
 0x13d   :  { %782 = vmatmul.mubr.msk.bf16.gmra.mrb[4].mxu1 %vm390_vm4, %v836_v49 }
 0x13e   :  { %785 = vmatprep.mubr.msk.bf16.mxu1 %vm849_vm0, %v848_v0 }
 0x145   :  { %786 = vmatmul.mubr.msk.bf16.gmra.mrb[8].mxu1 %vm390_vm4, %v837_v50 }
 0x146   :  { %789 = vmatprep.mubr.msk.bf16.mxu1 %vm849_vm0, %v848_v0 }
 0x14d   :  { %790 = vmatmul.mubr.msk.bf16.gmra.mrb[12].mxu1 %vm390_vm4, %v838_v51 }
 0x14e   :  { %793 = vmatprep.mubr.msk.bf16.mxu1 %vm849_vm0, %v848_v0 }
 0x155   :  { %794 = vmatmul.mubr.msk.bf16.gmra.mrb[16].mxu1 %vm390_vm4, %v839_v52 }
 0x156   :  { %797 = vmatprep.mubr.msk.bf16.mxu1 %vm849_vm0, %v848_v0 }
 0x15d   :  { %798 = vmatmul.mubr.msk.bf16.gmra.mrb[20].mxu1 %vm390_vm4, %v840_v53  ;;  %v568_v53 = vld [vmem:[%s1084_s5] sm:$0x1] }
 0x15e   :  { %801 = vmatprep.mubr.msk.bf16.mxu1 %vm849_vm0, %v848_v0 }
 0x165   :  { %802 = vmatmul.mubr.msk.bf16.gmra.mrb[24].mxu1 %vm390_vm4, %v841_v54  ;;  %v577_v54 = vpop.permute.xlu0 %576 }
 0x166   :  { %813 = vmatprep.mubr.msk.bf16.mxu1 %vm849_vm0, %v848_v0 }
 0x208   :  { %v450_v55 = vpop.f32.mrb[0].mxu1 }
 0x209   :  { %v779_v56 = vpop.f32.mrb[1].mxu1 }
 0x20a   :  { %v453_v57 = vpop.f32.mrb[2].mxu1 }
 0x20b   :  { %v780_v58 = vpop.f32.mrb[3].mxu1 }
 0x210   :  { %v458_v59 = vpop.f32.mrb[4].mxu1 }
 0x211   :  { %v783_v60 = vpop.f32.mrb[5].mxu1 }
 0x212   :  { %v461_v61 = vpop.f32.mrb[6].mxu1 }
 0x213   :  { %v784_v62 = vpop.f32.mrb[7].mxu1 }
 0x218   :  { %v466_v63 = vpop.f32.mrb[8].mxu1 }
 0x219   :  { %v787_v1 = vpop.f32.mrb[9].mxu1 }
 0x21a   :  { %v469_v2 = vpop.f32.mrb[10].mxu1 }
 0x21b   :  { %v788_v3 = vpop.f32.mrb[11].mxu1 }
 0x220   :  { %v474_v4 = vpop.f32.mrb[12].mxu1 }
 0x221   :  { %v791_v5 = vpop.f32.mrb[13].mxu1 }
 0x222   :  { %v477_v6 = vpop.f32.mrb[14].mxu1 }
 0x223   :  { %v505_v7 = vmax.f32 %v450_v55, %v477_v6  ;;  %v792_v8 = vpop.f32.mrb[15].mxu1 }
 0x225   :  { %v554_v11 = vadd.f32 %v522_v9, %v505_v7 }
 0x227   :  { %v561_v19 = vmax.f32 %v554_v11, 0.0 }
 0x228   :  { %v482_v10 = vpop.f32.mrb[16].mxu1 }
 0x229   :  { %v506_v12 = vmax.f32 %v453_v57, %v482_v10  ;;  %v795_v13 = vpop.f32.mrb[17].mxu1 }
 0x22a   :  { %v485_v15 = vpop.f32.mrb[18].mxu1 }
 0x22b   :  { %v555_v16 = vadd.f32 %v527_v14, %v506_v12  ;;  %v507_v17 = vmax.f32 %v458_v59, %v485_v15  ;;  %v796_v18 = vpop.f32.mrb[19].mxu1 }
 0x22d   :  { %v562_v20 = vmax.f32 %v555_v16, 0.0  ;;  %v556_v24 = vadd.f32 %v532_v22, %v507_v17 }
 0x22f   :  { %v569_v21 = vpack.c.bf16 %v562_v20, %v561_v19  ;;  %v563_v32 = vmax.f32 %v556_v24, 0.0 }
 0x230   :  { %v490_v23 = vpop.f32.mrb[20].mxu1 }
 0x231   :  { %v508_v25 = vmax.f32 %v461_v61, %v490_v23  ;;  %v799_v26 = vpop.f32.mrb[21].mxu1  ;;  %806 = vmatpush3.bf16.msra.mxu1 %v569_v21 }
 0x232   :  { %v493_v28 = vpop.f32.mrb[22].mxu1  ;;  %807 = vmatprep.subr.bf16.mxu1 %v848_v0 }
 0x233   :  { %v557_v29 = vadd.f32 %v537_v27, %v508_v25  ;;  %v509_v30 = vmax.f32 %v466_v63, %v493_v28  ;;  %v800_v31 = vpop.f32.mrb[23].mxu1 }
 0x235   :  { %v564_v33 = vmax.f32 %v557_v29, 0.0  ;;  %v558_v37 = vadd.f32 %v542_v34, %v509_v30 }
 0x237   :  { %v570_v35 = vpack.c.bf16 %v564_v33, %v563_v32  ;;  %v565_v46 = vmax.f32 %v558_v37, 0.0 }
 0x238   :  { %v498_v36 = vpop.f32.mrb[24].mxu1 }
 0x239   :  { %v510_v38 = vmax.f32 %v469_v2, %v498_v36  ;;  %v803_v39 = vpop.f32.mrb[25].mxu1  ;;  %808 = vmatpush3.bf16.msra.mxu1 %v570_v35 }
 0x23a   :  { %v501_v41 = vpop.f32.mrb[26].mxu1  ;;  %809 = vmatprep.subr.bf16.mxu1 %v848_v0 }
 0x23b   :  { %v559_v42 = vadd.f32 %v547_v40, %v510_v38  ;;  %v511_v43 = vmax.f32 %v474_v4, %v501_v41  ;;  %v804_v44 = vpop.f32.mrb[27].mxu1 }
 0x23d   :  { %v566_v47 = vmax.f32 %v559_v42, 0.0  ;;  %v560_v48 = vadd.f32 %v552_v45, %v511_v43 }
 0x23f   :  { %v571_v49 = vpack.c.bf16 %v566_v47, %v565_v46  ;;  %v567_v50 = vmax.f32 %v560_v48, 0.0 }
 0x241   :  { %v572_v51 = vpack.c.bf16 %v567_v50, %v567_v50  ;;  %810 = vmatpush3.bf16.msra.mxu1 %v571_v49 }
 0x242   :  { %811 = vmatprep.subr.bf16.mxu1 %v848_v0 }
 0x243   :  { %v584_v52 = vsel %vm412_vm3, %v572_v51, 0 }
 0x245   :  { %812 = vmatpush3.bf16.msra.mxu1 %v584_v52 }
 0x248   :  { %814 = vmatmul.mubr.msk.bf16.vlgmr.msra.gmra.mrb[28].mxu1 %vm579_vm5, %v568_v53 }
 0x31b   :  { %v620_v55 = vpop.f32.mrb[28].mxu1 }
 0x31c   :  { %v621_v56 = vadd.f32 %v620_v55, %v577_v54  ;;  %v815_v57 = vpop.f32.mrb[29].mxu1 }
 0x31d   :  { %v623_v58 = vpop.f32.mrb[30].mxu1 }
 0x31e   :  { %v627_v59 = vrot.slane %v621_v56, 1  ;;  %v816_v60 = vpop.f32.mrb[31].mxu1 }
 0x320   :  { %v629_v61 = vmax.f32 %v621_v56, %v627_v59 }
 0x322   :  { %v630_v62 = vsub.f32 %v621_v56, %v629_v61  ;;  %v634_v63 = vrot.slane %v629_v61, 7 }
 0x324   :  { %v636_v0 = vsub.f32 %v621_v56, %v634_v63  ;;  %v631_v1 = vmul.f32 1.442695, %v630_v62 }
 0x326   :  { %v637_v2 = vmul.f32 1.442695, %v636_v0 }
 0x328   :  { %842 = vpow2.f32 %v637_v2 }
 0x329   :  { %844 = vpow2.f32 %v631_v1 }
 0x332   :  { %v843_v3 = vpop.eup %842 }
 0x333   :  { %v640_v4 = vrot.slane %v843_v3, 1  ;;  %v845_v5 = vpop.eup %844 }
 0x335   :  { %v642_v6 = vadd.f32 %v845_v5, %v640_v4 }
 0x337   :  { %846 = vrcp.f32 %v642_v6 }
 0x341   :  { %v847_v7 = vpop.eup %846 }
 0x342   :  { %v647_v8 = vrot.slane %v847_v7, 7  ;;  %v645_v9 = vmul.f32 %v847_v7, %v845_v5 }
 0x344   :  { %v649_v10 = vmul.f32 %v843_v3, %v647_v8 }
 0x346   :  { %v650_v11 = vsel %vm146_vm1, %v645_v9, %v649_v10 }
 0x347   :  { %651 = vst [vmem:[%s1085_s7] sm:$0x3] %v650_v11 }

</bundles_post_ra>
